<compile_context>
chip_gen: v7x
topology: tpu7x:2x2x1
jax: 0.10.0
libtpu: 0.0.40
codegen_flags: <defaults>
</compile_context>

<pallas_src>
import math
import jax
import jax.numpy as jnp
from jax.experimental import pallas as pl
from jax.experimental.pallas import tpu as pltpu

# ---------------- tiny-RoBERTa config ----------------
BATCH = 2
SEQ = 8
HIDDEN = 32
NUM_HEADS = 2
HEAD_DIM = HIDDEN // NUM_HEADS
INTERMEDIATE = 64
NUM_LAYERS = 2
VOCAB = 64
MAX_POS = 32
PAD_IDX = 1          # RoBERTa padding_idx
LN_EPS = 1e-5
TOKENS = BATCH * SEQ


# ---------------- in-kernel helpers (value -> value) ----------------
def _layernorm(x, g, b):
    mean = jnp.mean(x, axis=-1, keepdims=True)
    var = jnp.mean(jnp.square(x - mean), axis=-1, keepdims=True)
    return (x - mean) * jax.lax.rsqrt(var + LN_EPS) * g + b


def _gelu(x):
    # TODO(synk): HF RoBERTa "gelu" is the exact erf form; erf lowering is not
    # guaranteed in Mosaic, so the tanh approximation is used here.
    c = math.sqrt(2.0 / math.pi)
    return 0.5 * x * (1.0 + jnp.tanh(c * (x + 0.044715 * x * x * x)))


# ---------------- fused encoder kernel ----------------
def _encoder_kernel(emb_ref, mask_ref, embg_ref, embb_ref,
                    wqkv_ref, bqkv_ref, wo_ref, bo_ref,
                    ln1g_ref, ln1b_ref, w1_ref, b1_ref, w2_ref, b2_ref,
                    ln2g_ref, ln2b_ref, out_ref):
    layer = pl.program_id(0)

    # Layer 0: apply the embedding LayerNorm and seed the resident hidden state.
    @pl.when(layer == 0)
    def _():
        out_ref[...] = _layernorm(emb_ref[...], embg_ref[...], embb_ref[...])

    x = out_ref[...]                                      # [B*S, H], VMEM-resident

    # Fused QKV projection: a single MXU matmul with 3*H output lanes.
    qkv = jnp.dot(x, wqkv_ref[...], preferred_element_type=jnp.float32) + bqkv_ref[...]

    scale = 1.0 / math.sqrt(HEAD_DIM)
    mask = mask_ref[...]                                  # [B, S] additive mask

    # Attention for all (batch, head) pairs, fully unrolled (static tiny loops).
    batch_ctx = []
    for b in range(BATCH):
        rows = qkv[b * SEQ:(b + 1) * SEQ, :]              # [S, 3H]
        m_b = mask[b:b + 1, :]                            # [1, S]
        head_outs = []
        for h in range(NUM_HEADS):
            q = rows[:, h * HEAD_DIM:(h + 1) * HEAD_DIM] * scale
            k = rows[:, HIDDEN + h * HEAD_DIM:HIDDEN + (h + 1) * HEAD_DIM]
            v = rows[:, 2 * HIDDEN + h * HEAD_DIM:2 * HIDDEN + (h + 1) * HEAD_DIM]
            s = jnp.dot(q, k.T, preferred_element_type=jnp.float32) + m_b
            s = s - jnp.max(s, axis=-1, keepdims=True)
            p = jnp.exp(s)
            inv_l = pl.reciprocal(jnp.sum(p, axis=-1, keepdims=True), approx=True)
            p = p * inv_l
            head_outs.append(jnp.dot(p, v, preferred_element_type=jnp.float32))
        batch_ctx.append(jnp.concatenate(head_outs, axis=-1))   # [S, H]
    ctx = jnp.concatenate(batch_ctx, axis=0)              # [B*S, H]

    # Output projection + residual + LN1.
    attn_out = jnp.dot(ctx, wo_ref[...], preferred_element_type=jnp.float32) + bo_ref[...]
    h1 = _layernorm(attn_out + x, ln1g_ref[...], ln1b_ref[...])

    # FFN (intermediate stays in VMEM/vregs) + residual + LN2.
    ffn = jnp.dot(h1, w1_ref[...], preferred_element_type=jnp.float32) + b1_ref[...]
    ffn = _gelu(ffn)
    ffn = jnp.dot(ffn, w2_ref[...], preferred_element_type=jnp.float32) + b2_ref[...]
    out_ref[...] = _layernorm(ffn + h1, ln2g_ref[...], ln2b_ref[...])


# ---------------- wrapper ----------------
def roberta_encoder(emb2d, add_mask, emb_ln_g, emb_ln_b, stacked):
    def full2d(shape):
        return pl.BlockSpec(shape, lambda l: (0, 0))

    def per_layer(shape):
        return pl.BlockSpec((None,) + shape, lambda l: (l, 0, 0))

    in_specs = [
        full2d((TOKENS, HIDDEN)),           # emb
        full2d((BATCH, SEQ)),               # additive mask
        full2d((1, HIDDEN)),                # emb LN gamma
        full2d((1, HIDDEN)),                # emb LN beta
        per_layer((HIDDEN, 3 * HIDDEN)),    # wqkv
        per_layer((1, 3 * HIDDEN)),         # bqkv
        per_layer((HIDDEN, HIDDEN)),        # wo
        per_layer((1, HIDDEN)),             # bo
        per_layer((1, HIDDEN)),             # ln1 gamma
        per_layer((1, HIDDEN)),             # ln1 beta
        per_layer((HIDDEN, INTERMEDIATE)),  # w1
        per_layer((1, INTERMEDIATE)),       # b1
        per_layer((INTERMEDIATE, HIDDEN)),  # w2
        per_layer((1, HIDDEN)),             # b2
        per_layer((1, HIDDEN)),             # ln2 gamma
        per_layer((1, HIDDEN)),             # ln2 beta
    ]
    return pl.pallas_call(
        _encoder_kernel,
        grid=(NUM_LAYERS,),
        in_specs=in_specs,
        out_specs=pl.BlockSpec((TOKENS, HIDDEN), lambda l: (0, 0)),
        out_shape=jax.ShapeDtypeStruct((TOKENS, HIDDEN), jnp.float32),
        compiler_params=pltpu.CompilerParams(dimension_semantics=("arbitrary",)),
    )(
        emb2d, add_mask,
        emb_ln_g.reshape(1, HIDDEN), emb_ln_b.reshape(1, HIDDEN),
        stacked["wqkv"], stacked["bqkv"], stacked["wo"], stacked["bo"],
        stacked["ln1_g"], stacked["ln1_b"], stacked["w1"], stacked["b1"],
        stacked["w2"], stacked["b2"], stacked["ln2_g"], stacked["ln2_b"],
    )


def pack_encoder_params(params):
    """Stack per-layer weights along a leading layer axis for the fused kernel."""
    layers = params["layers"]

    def stack(fn):
        return jnp.stack([fn(l) for l in layers], axis=0)

    return {
        "wqkv": stack(lambda l: jnp.concatenate([l["wq"], l["wk"], l["wv"]], axis=1)),
        "bqkv": stack(lambda l: jnp.concatenate([l["bq"], l["bk"], l["bv"]]).reshape(1, -1)),
        "wo":   stack(lambda l: l["wo"]),
        "bo":   stack(lambda l: l["bo"].reshape(1, -1)),
        "ln1_g": stack(lambda l: l["ln1_g"].reshape(1, -1)),
        "ln1_b": stack(lambda l: l["ln1_b"].reshape(1, -1)),
        "w1":   stack(lambda l: l["w1"]),
        "b1":   stack(lambda l: l["b1"].reshape(1, -1)),
        "w2":   stack(lambda l: l["w2"]),
        "b2":   stack(lambda l: l["b2"].reshape(1, -1)),
        "ln2_g": stack(lambda l: l["ln2_g"].reshape(1, -1)),
        "ln2_b": stack(lambda l: l["ln2_b"].reshape(1, -1)),
    }


# ---------------- parameters (deterministic, synthetic) ----------------
def init_params(key):
    def nrm(k, shape):
        return (jax.random.normal(k, shape, jnp.float32) * 0.02).astype(jnp.float32)

    keys = iter(jax.random.split(key, 8 + NUM_LAYERS * 12))
    params = {
        "word_emb": nrm(next(keys), (VOCAB, HIDDEN)),
        "pos_emb": nrm(next(keys), (MAX_POS, HIDDEN)),
        "type_emb": nrm(next(keys), (1, HIDDEN)),
        "emb_ln_g": jnp.ones((HIDDEN,), jnp.float32),
        "emb_ln_b": jnp.zeros((HIDDEN,), jnp.float32),
        "head_w": nrm(next(keys), (HIDDEN, 1)),
        "head_b": jnp.zeros((1,), jnp.float32),
        "layers": [],
    }
    for _ in range(NUM_LAYERS):
        layer = {
            "wq": nrm(next(keys), (HIDDEN, HIDDEN)), "bq": jnp.zeros((HIDDEN,), jnp.float32),
            "wk": nrm(next(keys), (HIDDEN, HIDDEN)), "bk": jnp.zeros((HIDDEN,), jnp.float32),
            "wv": nrm(next(keys), (HIDDEN, HIDDEN)), "bv": jnp.zeros((HIDDEN,), jnp.float32),
            "wo": nrm(next(keys), (HIDDEN, HIDDEN)), "bo": jnp.zeros((HIDDEN,), jnp.float32),
            "ln1_g": jnp.ones((HIDDEN,), jnp.float32), "ln1_b": jnp.zeros((HIDDEN,), jnp.float32),
            "w1": nrm(next(keys), (HIDDEN, INTERMEDIATE)), "b1": jnp.zeros((INTERMEDIATE,), jnp.float32),
            "w2": nrm(next(keys), (INTERMEDIATE, HIDDEN)), "b2": jnp.zeros((HIDDEN,), jnp.float32),
            "ln2_g": jnp.ones((HIDDEN,), jnp.float32), "ln2_b": jnp.zeros((HIDDEN,), jnp.float32),
        }
        params["layers"].append(layer)
    return params


# ---------------- forward pass ----------------
def single_head_roberta_forward(params, input_ids, attention_mask):
    b, s = input_ids.shape

    # --- embeddings (gather is glue JAX) ---
    not_pad = (input_ids != PAD_IDX).astype(jnp.int32)
    position_ids = jnp.cumsum(not_pad, axis=1) * not_pad + PAD_IDX
    token_type_ids = jnp.zeros_like(input_ids)
    emb = (
        jnp.take(params["word_emb"], input_ids, axis=0)
        + jnp.take(params["pos_emb"], position_ids, axis=0)
        + jnp.take(params["type_emb"], token_type_ids, axis=0)
    )
    emb2d = emb.reshape(b * s, HIDDEN)

    # additive attention mask, [B, S]
    add_mask = (1.0 - attention_mask.astype(jnp.float32)) * -1e9

    # --- entire encoder (emb LN + all layers) in ONE fused Pallas kernel ---
    stacked = pack_encoder_params(params)
    hidden2d = roberta_encoder(
        emb2d, add_mask, params["emb_ln_g"], params["emb_ln_b"], stacked
    )

    last_hidden = hidden2d.reshape(b, s, HIDDEN)
    pooled = last_hidden[:, 0]                 # CLS token, [B, H]
    # pooled dropout: identity in eval mode.
    # 1-output-lane head projection in plain JAX (Pallas launch is pure overhead).
    logits = (pooled @ params["head_w"] + params["head_b"]).reshape(-1)  # [B]
    return logits


if __name__ == "__main__":
    key = jax.random.PRNGKey(0)
    k_param, k_ids = jax.random.split(key)

    params = init_params(k_param)

    input_ids = jax.random.randint(k_ids, (BATCH, SEQ), 2, VOCAB, dtype=jnp.int32)
    attention_mask = jnp.ones((BATCH, SEQ), dtype=jnp.int32)
    # give batch 1 two padding positions to exercise masking / position ids
    input_ids = input_ids.at[1, -2:].set(PAD_IDX)
    attention_mask = attention_mask.at[1, -2:].set(0)

    fwd = jax.jit(single_head_roberta_forward)
    logits = fwd(params, input_ids, attention_mask)
    jax.block_until_ready(logits)

    assert logits.shape == (BATCH,)
    assert bool(jnp.all(jnp.isfinite(logits)))
    print("KERNEL_OK")
</pallas_src>

<mosaic_0001>
module attributes {stable_mosaic.version = 11 : i64} {
  func.func @_encoder_kernel(%arg0: i32, %arg1: memref<16x32xf32, #tpu.memory_space<vmem>>, %arg2: memref<2x8xf32, #tpu.memory_space<vmem>>, %arg3: memref<1x32xf32, #tpu.memory_space<vmem>>, %arg4: memref<1x32xf32, #tpu.memory_space<vmem>>, %arg5: memref<1x32x96xf32, #tpu.memory_space<vmem>>, %arg6: memref<1x1x96xf32, #tpu.memory_space<vmem>>, %arg7: memref<1x32x32xf32, #tpu.memory_space<vmem>>, %arg8: memref<1x1x32xf32, #tpu.memory_space<vmem>>, %arg9: memref<1x1x32xf32, #tpu.memory_space<vmem>>, %arg10: memref<1x1x32xf32, #tpu.memory_space<vmem>>, %arg11: memref<1x32x64xf32, #tpu.memory_space<vmem>>, %arg12: memref<1x1x64xf32, #tpu.memory_space<vmem>>, %arg13: memref<1x64x32xf32, #tpu.memory_space<vmem>>, %arg14: memref<1x1x32xf32, #tpu.memory_space<vmem>>, %arg15: memref<1x1x32xf32, #tpu.memory_space<vmem>>, %arg16: memref<1x1x32xf32, #tpu.memory_space<vmem>>, %arg17: memref<16x32xf32, #tpu.memory_space<vmem>>) attributes {dimension_semantics = [#tpu.dimension_semantics<arbitrary>], iteration_bounds = array<i64: 2>, scalar_prefetch = 0 : i64, scratch_operands = 0 : i64, tpu.core_type = #tpu.core_type<tc>, window_params = [{pipeline_mode = #tpu.pipeline_mode<synchronous>, transform_indices = @transform_0, window_bounds = array<i64: 16, 32>}, {pipeline_mode = #tpu.pipeline_mode<synchronous>, transform_indices = @transform_1, window_bounds = array<i64: 2, 8>}, {pipeline_mode = #tpu.pipeline_mode<synchronous>, transform_indices = @transform_2, window_bounds = array<i64: 1, 32>}, {pipeline_mode = #tpu.pipeline_mode<synchronous>, transform_indices = @transform_3, window_bounds = array<i64: 1, 32>}, {transform_indices = @transform_4, window_bounds = array<i64: 1, 32, 96>}, {transform_indices = @transform_5, window_bounds = array<i64: 1, 1, 96>}, {transform_indices = @transform_6, window_bounds = array<i64: 1, 32, 32>}, {transform_indices = @transform_7, window_bounds = array<i64: 1, 1, 32>}, {transform_indices = @transform_8, window_bounds = array<i64: 1, 1, 32>}, {transform_indices = @transform_9, window_bounds = array<i64: 1, 1, 32>}, {transform_indices = @transform_10, window_bounds = array<i64: 1, 32, 64>}, {transform_indices = @transform_11, window_bounds = array<i64: 1, 1, 64>}, {transform_indices = @transform_12, window_bounds = array<i64: 1, 64, 32>}, {transform_indices = @transform_13, window_bounds = array<i64: 1, 1, 32>}, {transform_indices = @transform_14, window_bounds = array<i64: 1, 1, 32>}, {transform_indices = @transform_15, window_bounds = array<i64: 1, 1, 32>}, {pipeline_mode = #tpu.pipeline_mode<synchronous>, transform_indices = @transform_16, window_bounds = array<i64: 16, 32>}]} {
    %c0_i32 = arith.constant 0 : i32
    %0 = arith.cmpi eq, %arg0, %c0_i32 : i32
    %1 = arith.extui %0 : i1 to i32
    %c0_i32_0 = arith.constant 0 : i32
    %2 = arith.cmpi ne, %1, %c0_i32_0 : i32
    scf.if %2 {
      %c0_79 = arith.constant 0 : index
      %c0_80 = arith.constant 0 : index
      %188 = vector.load %arg1[%c0_79, %c0_80] : memref<16x32xf32, #tpu.memory_space<vmem>>, vector<16x32xf32>
      %c0_81 = arith.constant 0 : index
      %c0_82 = arith.constant 0 : index
      %189 = vector.load %arg3[%c0_81, %c0_82] : memref<1x32xf32, #tpu.memory_space<vmem>>, vector<1x32xf32>
      %c0_83 = arith.constant 0 : index
      %c0_84 = arith.constant 0 : index
      %190 = vector.load %arg4[%c0_83, %c0_84] : memref<1x32xf32, #tpu.memory_space<vmem>>, vector<1x32xf32>
      %cst_85 = arith.constant dense<0.000000e+00> : vector<16xf32>
      %191 = vector.multi_reduction <add>, %188, %cst_85 [1] : vector<16x32xf32> to vector<16xf32>
      %192 = vector.shape_cast %191 : vector<16xf32> to vector<16x1xf32>
      %cst_86 = arith.constant 3.200000e+01 : f32
      %193 = vector.broadcast %cst_86 : f32 to vector<16x1xf32>
      %194 = arith.divf %192, %193 : vector<16x1xf32>
      %195 = vector.broadcast %194 : vector<16x1xf32> to vector<16x32xf32>
      %196 = arith.subf %188, %195 : vector<16x32xf32>
      %197 = arith.mulf %196, %196 : vector<16x32xf32>
      %cst_87 = arith.constant dense<0.000000e+00> : vector<16xf32>
      %198 = vector.multi_reduction <add>, %197, %cst_87 [1] : vector<16x32xf32> to vector<16xf32>
      %199 = vector.shape_cast %198 : vector<16xf32> to vector<16x1xf32>
      %cst_88 = arith.constant 3.200000e+01 : f32
      %200 = vector.broadcast %cst_88 : f32 to vector<16x1xf32>
      %201 = arith.divf %199, %200 : vector<16x1xf32>
      %202 = vector.broadcast %194 : vector<16x1xf32> to vector<16x32xf32>
      %203 = arith.subf %188, %202 : vector<16x32xf32>
      %cst_89 = arith.constant 9.99999974E-6 : f32
      %204 = vector.broadcast %cst_89 : f32 to vector<16x1xf32>
      %205 = arith.addf %201, %204 : vector<16x1xf32>
      %206 = math.rsqrt %205 : vector<16x1xf32>
      %207 = vector.broadcast %206 : vector<16x1xf32> to vector<16x32xf32>
      %208 = arith.mulf %203, %207 : vector<16x32xf32>
      %209 = vector.broadcast %189 : vector<1x32xf32> to vector<16x32xf32>
      %210 = arith.mulf %208, %209 : vector<16x32xf32>
      %211 = vector.broadcast %190 : vector<1x32xf32> to vector<16x32xf32>
      %212 = arith.addf %210, %211 : vector<16x32xf32>
      %c0_90 = arith.constant 0 : index
      %c0_91 = arith.constant 0 : index
      %213 = vector.load %arg17[%c0_90, %c0_91] : memref<16x32xf32, #tpu.memory_space<vmem>>, vector<16x32xf32>
      tpu.vector_store %arg17[%c0_90, %c0_91], %212 {strides = array<i32>} : memref<16x32xf32, #tpu.memory_space<vmem>>, vector<16x32xf32>,
    } else {
    }
    %c0 = arith.constant 0 : index
    %c0_1 = arith.constant 0 : index
    %3 = vector.load %arg17[%c0, %c0_1] : memref<16x32xf32, #tpu.memory_space<vmem>>, vector<16x32xf32>
    %c0_2 = arith.constant 0 : index
    %c0_3 = arith.constant 0 : index
    %c0_4 = arith.constant 0 : index
    %4 = vector.load %arg5[%c0_2, %c0_3, %c0_4] : memref<1x32x96xf32, #tpu.memory_space<vmem>>, vector<1x32x96xf32>
    %5 = vector.shape_cast %4 : vector<1x32x96xf32> to vector<32x96xf32>
    %cst = arith.constant dense<0.000000e+00> : vector<16x96xf32>
    %6 = tpu.matmul %3, %5, %cst {dimension_numbers = #tpu.dot_dimension_numbers<[1], [0], [0], [1], [0, 0, 1, 1], [], []>} : vector<16x32xf32>, vector<32x96xf32>, vector<16x96xf32> -> vector<16x96xf32>
    %c0_5 = arith.constant 0 : index
    %c0_6 = arith.constant 0 : index
    %c0_7 = arith.constant 0 : index
    %7 = vector.load %arg6[%c0_5, %c0_6, %c0_7] : memref<1x1x96xf32, #tpu.memory_space<vmem>>, vector<1x1x96xf32>
    %8 = vector.shape_cast %7 : vector<1x1x96xf32> to vector<1x96xf32>
    %9 = vector.broadcast %8 : vector<1x96xf32> to vector<16x96xf32>
    %10 = arith.addf %6, %9 : vector<16x96xf32>
    %c0_8 = arith.constant 0 : index
    %c0_9 = arith.constant 0 : index
    %11 = vector.load %arg2[%c0_8, %c0_9] : memref<2x8xf32, #tpu.memory_space<vmem>>, vector<2x8xf32>
    %12 = vector.extract_strided_slice %10 {offsets = [0, 0], sizes = [8, 96], strides = [1, 1]} : vector<16x96xf32> to vector<8x96xf32>
    %13 = vector.extract_strided_slice %11 {offsets = [0, 0], sizes = [1, 8], strides = [1, 1]} : vector<2x8xf32> to vector<1x8xf32>
    %14 = vector.extract_strided_slice %12 {offsets = [0, 0], sizes = [8, 16], strides = [1, 1]} : vector<8x96xf32> to vector<8x16xf32>
    %cst_10 = arith.constant 2.500000e-01 : f32
    %15 = vector.broadcast %cst_10 : f32 to vector<8x16xf32>
    %16 = arith.mulf %14, %15 : vector<8x16xf32>
    %17 = vector.extract_strided_slice %12 {offsets = [0, 32], sizes = [8, 16], strides = [1, 1]} : vector<8x96xf32> to vector<8x16xf32>
    %18 = vector.extract_strided_slice %12 {offsets = [0, 64], sizes = [8, 16], strides = [1, 1]} : vector<8x96xf32> to vector<8x16xf32>
    %19 = tpu.transpose %17, [1, 0] : vector<8x16xf32> -> vector<16x8xf32>
    %cst_11 = arith.constant dense<0.000000e+00> : vector<8x8xf32>
    %20 = tpu.matmul %16, %19, %cst_11 {dimension_numbers = #tpu.dot_dimension_numbers<[1], [0], [0], [1], [0, 0, 1, 1], [], []>} : vector<8x16xf32>, vector<16x8xf32>, vector<8x8xf32> -> vector<8x8xf32>
    %21 = vector.broadcast %13 : vector<1x8xf32> to vector<8x8xf32>
    %22 = arith.addf %20, %21 : vector<8x8xf32>
    %cst_12 = arith.constant dense<0xFF800000> : vector<8xf32>
    %23 = vector.multi_reduction <maximumf>, %22, %cst_12 [1] : vector<8x8xf32> to vector<8xf32>
    %24 = vector.shape_cast %23 : vector<8xf32> to vector<8x1xf32>
    %25 = vector.broadcast %24 : vector<8x1xf32> to vector<8x8xf32>
    %26 = arith.subf %22, %25 : vector<8x8xf32>
    %27 = math.exp %26 : vector<8x8xf32>
    %cst_13 = arith.constant dense<0.000000e+00> : vector<8xf32>
    %28 = vector.multi_reduction <add>, %27, %cst_13 [1] : vector<8x8xf32> to vector<8xf32>
    %29 = vector.shape_cast %28 : vector<8xf32> to vector<8x1xf32>
    %30 = tpu.reciprocal %29 {approx = true} : vector<8x1xf32> -> vector<8x1xf32>
    %31 = vector.broadcast %30 : vector<8x1xf32> to vector<8x8xf32>
    %32 = arith.mulf %27, %31 : vector<8x8xf32>
    %cst_14 = arith.constant dense<0.000000e+00> : vector<8x16xf32>
    %33 = tpu.matmul %32, %18, %cst_14 {dimension_numbers = #tpu.dot_dimension_numbers<[1], [0], [0], [1], [0, 0, 1, 1], [], []>} : vector<8x8xf32>, vector<8x16xf32>, vector<8x16xf32> -> vector<8x16xf32>
    %34 = vector.extract_strided_slice %12 {offsets = [0, 16], sizes = [8, 16], strides = [1, 1]} : vector<8x96xf32> to vector<8x16xf32>
    %cst_15 = arith.constant 2.500000e-01 : f32
    %35 = vector.broadcast %cst_15 : f32 to vector<8x16xf32>
    %36 = arith.mulf %34, %35 : vector<8x16xf32>
    %37 = vector.extract_strided_slice %12 {offsets = [0, 48], sizes = [8, 16], strides = [1, 1]} : vector<8x96xf32> to vector<8x16xf32>
    %38 = vector.extract_strided_slice %12 {offsets = [0, 80], sizes = [8, 16], strides = [1, 1]} : vector<8x96xf32> to vector<8x16xf32>
    %39 = tpu.transpose %37, [1, 0] : vector<8x16xf32> -> vector<16x8xf32>
    %cst_16 = arith.constant dense<0.000000e+00> : vector<8x8xf32>
    %40 = tpu.matmul %36, %39, %cst_16 {dimension_numbers = #tpu.dot_dimension_numbers<[1], [0], [0], [1], [0, 0, 1, 1], [], []>} : vector<8x16xf32>, vector<16x8xf32>, vector<8x8xf32> -> vector<8x8xf32>
    %41 = vector.broadcast %13 : vector<1x8xf32> to vector<8x8xf32>
    %42 = arith.addf %40, %41 : vector<8x8xf32>
    %cst_17 = arith.constant dense<0xFF800000> : vector<8xf32>
    %43 = vector.multi_reduction <maximumf>, %42, %cst_17 [1] : vector<8x8xf32> to vector<8xf32>
    %44 = vector.shape_cast %43 : vector<8xf32> to vector<8x1xf32>
    %45 = vector.broadcast %44 : vector<8x1xf32> to vector<8x8xf32>
    %46 = arith.subf %42, %45 : vector<8x8xf32>
    %47 = math.exp %46 : vector<8x8xf32>
    %cst_18 = arith.constant dense<0.000000e+00> : vector<8xf32>
    %48 = vector.multi_reduction <add>, %47, %cst_18 [1] : vector<8x8xf32> to vector<8xf32>
    %49 = vector.shape_cast %48 : vector<8xf32> to vector<8x1xf32>
    %50 = tpu.reciprocal %49 {approx = true} : vector<8x1xf32> -> vector<8x1xf32>
    %51 = vector.broadcast %50 : vector<8x1xf32> to vector<8x8xf32>
    %52 = arith.mulf %47, %51 : vector<8x8xf32>
    %cst_19 = arith.constant dense<0.000000e+00> : vector<8x16xf32>
    %53 = tpu.matmul %52, %38, %cst_19 {dimension_numbers = #tpu.dot_dimension_numbers<[1], [0], [0], [1], [0, 0, 1, 1], [], []>} : vector<8x8xf32>, vector<8x16xf32>, vector<8x16xf32> -> vector<8x16xf32>
    %54 = tpu.concatenate %33, %53 in 1 : vector<8x16xf32>, vector<8x16xf32> -> vector<8x32xf32>
    %55 = vector.extract_strided_slice %10 {offsets = [8, 0], sizes = [8, 96], strides = [1, 1]} : vector<16x96xf32> to vector<8x96xf32>
    %56 = vector.extract_strided_slice %11 {offsets = [1, 0], sizes = [1, 8], strides = [1, 1]} : vector<2x8xf32> to vector<1x8xf32>
    %57 = vector.extract_strided_slice %55 {offsets = [0, 0], sizes = [8, 16], strides = [1, 1]} : vector<8x96xf32> to vector<8x16xf32>
    %cst_20 = arith.constant 2.500000e-01 : f32
    %58 = vector.broadcast %cst_20 : f32 to vector<8x16xf32>
    %59 = arith.mulf %57, %58 : vector<8x16xf32>
    %60 = vector.extract_strided_slice %55 {offsets = [0, 32], sizes = [8, 16], strides = [1, 1]} : vector<8x96xf32> to vector<8x16xf32>
    %61 = vector.extract_strided_slice %55 {offsets = [0, 64], sizes = [8, 16], strides = [1, 1]} : vector<8x96xf32> to vector<8x16xf32>
    %62 = tpu.transpose %60, [1, 0] : vector<8x16xf32> -> vector<16x8xf32>
    %cst_21 = arith.constant dense<0.000000e+00> : vector<8x8xf32>
    %63 = tpu.matmul %59, %62, %cst_21 {dimension_numbers = #tpu.dot_dimension_numbers<[1], [0], [0], [1], [0, 0, 1, 1], [], []>} : vector<8x16xf32>, vector<16x8xf32>, vector<8x8xf32> -> vector<8x8xf32>
    %64 = vector.broadcast %56 : vector<1x8xf32> to vector<8x8xf32>
    %65 = arith.addf %63, %64 : vector<8x8xf32>
    %cst_22 = arith.constant dense<0xFF800000> : vector<8xf32>
    %66 = vector.multi_reduction <maximumf>, %65, %cst_22 [1] : vector<8x8xf32> to vector<8xf32>
    %67 = vector.shape_cast %66 : vector<8xf32> to vector<8x1xf32>
    %68 = vector.broadcast %67 : vector<8x1xf32> to vector<8x8xf32>
    %69 = arith.subf %65, %68 : vector<8x8xf32>
    %70 = math.exp %69 : vector<8x8xf32>
    %cst_23 = arith.constant dense<0.000000e+00> : vector<8xf32>
    %71 = vector.multi_reduction <add>, %70, %cst_23 [1] : vector<8x8xf32> to vector<8xf32>
    %72 = vector.shape_cast %71 : vector<8xf32> to vector<8x1xf32>
    %73 = tpu.reciprocal %72 {approx = true} : vector<8x1xf32> -> vector<8x1xf32>
    %74 = vector.broadcast %73 : vector<8x1xf32> to vector<8x8xf32>
    %75 = arith.mulf %70, %74 : vector<8x8xf32>
    %cst_24 = arith.constant dense<0.000000e+00> : vector<8x16xf32>
    %76 = tpu.matmul %75, %61, %cst_24 {dimension_numbers = #tpu.dot_dimension_numbers<[1], [0], [0], [1], [0, 0, 1, 1], [], []>} : vector<8x8xf32>, vector<8x16xf32>, vector<8x16xf32> -> vector<8x16xf32>
    %77 = vector.extract_strided_slice %55 {offsets = [0, 16], sizes = [8, 16], strides = [1, 1]} : vector<8x96xf32> to vector<8x16xf32>
    %cst_25 = arith.constant 2.500000e-01 : f32
    %78 = vector.broadcast %cst_25 : f32 to vector<8x16xf32>
    %79 = arith.mulf %77, %78 : vector<8x16xf32>
    %80 = vector.extract_strided_slice %55 {offsets = [0, 48], sizes = [8, 16], strides = [1, 1]} : vector<8x96xf32> to vector<8x16xf32>
    %81 = vector.extract_strided_slice %55 {offsets = [0, 80], sizes = [8, 16], strides = [1, 1]} : vector<8x96xf32> to vector<8x16xf32>
    %82 = tpu.transpose %80, [1, 0] : vector<8x16xf32> -> vector<16x8xf32>
    %cst_26 = arith.constant dense<0.000000e+00> : vector<8x8xf32>
    %83 = tpu.matmul %79, %82, %cst_26 {dimension_numbers = #tpu.dot_dimension_numbers<[1], [0], [0], [1], [0, 0, 1, 1], [], []>} : vector<8x16xf32>, vector<16x8xf32>, vector<8x8xf32> -> vector<8x8xf32>
    %84 = vector.broadcast %56 : vector<1x8xf32> to vector<8x8xf32>
    %85 = arith.addf %83, %84 : vector<8x8xf32>
    %cst_27 = arith.constant dense<0xFF800000> : vector<8xf32>
    %86 = vector.multi_reduction <maximumf>, %85, %cst_27 [1] : vector<8x8xf32> to vector<8xf32>
    %87 = vector.shape_cast %86 : vector<8xf32> to vector<8x1xf32>
    %88 = vector.broadcast %87 : vector<8x1xf32> to vector<8x8xf32>
    %89 = arith.subf %85, %88 : vector<8x8xf32>
    %90 = math.exp %89 : vector<8x8xf32>
    %cst_28 = arith.constant dense<0.000000e+00> : vector<8xf32>
    %91 = vector.multi_reduction <add>, %90, %cst_28 [1] : vector<8x8xf32> to vector<8xf32>
    %92 = vector.shape_cast %91 : vector<8xf32> to vector<8x1xf32>
    %93 = tpu.reciprocal %92 {approx = true} : vector<8x1xf32> -> vector<8x1xf32>
    %94 = vector.broadcast %93 : vector<8x1xf32> to vector<8x8xf32>
    %95 = arith.mulf %90, %94 : vector<8x8xf32>
    %cst_29 = arith.constant dense<0.000000e+00> : vector<8x16xf32>
    %96 = tpu.matmul %95, %81, %cst_29 {dimension_numbers = #tpu.dot_dimension_numbers<[1], [0], [0], [1], [0, 0, 1, 1], [], []>} : vector<8x8xf32>, vector<8x16xf32>, vector<8x16xf32> -> vector<8x16xf32>
    %97 = tpu.concatenate %76, %96 in 1 : vector<8x16xf32>, vector<8x16xf32> -> vector<8x32xf32>
    %98 = tpu.concatenate %54, %97 in 0 : vector<8x32xf32>, vector<8x32xf32> -> vector<16x32xf32>
    %c0_30 = arith.constant 0 : index
    %c0_31 = arith.constant 0 : index
    %c0_32 = arith.constant 0 : index
    %99 = vector.load %arg7[%c0_30, %c0_31, %c0_32] : memref<1x32x32xf32, #tpu.memory_space<vmem>>, vector<1x32x32xf32>
    %100 = vector.shape_cast %99 : vector<1x32x32xf32> to vector<32x32xf32>
    %cst_33 = arith.constant dense<0.000000e+00> : vector<16x32xf32>
    %101 = tpu.matmul %98, %100, %cst_33 {dimension_numbers = #tpu.dot_dimension_numbers<[1], [0], [0], [1], [0, 0, 1, 1], [], []>} : vector<16x32xf32>, vector<32x32xf32>, vector<16x32xf32> -> vector<16x32xf32>
    %c0_34 = arith.constant 0 : index
    %c0_35 = arith.constant 0 : index
    %c0_36 = arith.constant 0 : index
    %102 = vector.load %arg8[%c0_34, %c0_35, %c0_36] : memref<1x1x32xf32, #tpu.memory_space<vmem>>, vector<1x1x32xf32>
    %103 = vector.shape_cast %102 : vector<1x1x32xf32> to vector<1x32xf32>
    %104 = vector.broadcast %103 : vector<1x32xf32> to vector<16x32xf32>
    %105 = arith.addf %101, %104 : vector<16x32xf32>
    %106 = arith.addf %105, %3 : vector<16x32xf32>
    %c0_37 = arith.constant 0 : index
    %c0_38 = arith.constant 0 : index
    %c0_39 = arith.constant 0 : index
    %107 = vector.load %arg9[%c0_37, %c0_38, %c0_39] : memref<1x1x32xf32, #tpu.memory_space<vmem>>, vector<1x1x32xf32>
    %108 = vector.shape_cast %107 : vector<1x1x32xf32> to vector<1x32xf32>
    %c0_40 = arith.constant 0 : index
    %c0_41 = arith.constant 0 : index
    %c0_42 = arith.constant 0 : index
    %109 = vector.load %arg10[%c0_40, %c0_41, %c0_42] : memref<1x1x32xf32, #tpu.memory_space<vmem>>, vector<1x1x32xf32>
    %110 = vector.shape_cast %109 : vector<1x1x32xf32> to vector<1x32xf32>
    %cst_43 = arith.constant dense<0.000000e+00> : vector<16xf32>
    %111 = vector.multi_reduction <add>, %106, %cst_43 [1] : vector<16x32xf32> to vector<16xf32>
    %112 = vector.shape_cast %111 : vector<16xf32> to vector<16x1xf32>
    %cst_44 = arith.constant 3.200000e+01 : f32
    %113 = vector.broadcast %cst_44 : f32 to vector<16x1xf32>
    %114 = arith.divf %112, %113 : vector<16x1xf32>
    %115 = vector.broadcast %114 : vector<16x1xf32> to vector<16x32xf32>
    %116 = arith.subf %106, %115 : vector<16x32xf32>
    %117 = arith.mulf %116, %116 : vector<16x32xf32>
    %cst_45 = arith.constant dense<0.000000e+00> : vector<16xf32>
    %118 = vector.multi_reduction <add>, %117, %cst_45 [1] : vector<16x32xf32> to vector<16xf32>
    %119 = vector.shape_cast %118 : vector<16xf32> to vector<16x1xf32>
    %cst_46 = arith.constant 3.200000e+01 : f32
    %120 = vector.broadcast %cst_46 : f32 to vector<16x1xf32>
    %121 = arith.divf %119, %120 : vector<16x1xf32>
    %122 = vector.broadcast %114 : vector<16x1xf32> to vector<16x32xf32>
    %123 = arith.subf %106, %122 : vector<16x32xf32>
    %cst_47 = arith.constant 9.99999974E-6 : f32
    %124 = vector.broadcast %cst_47 : f32 to vector<16x1xf32>
    %125 = arith.addf %121, %124 : vector<16x1xf32>
    %126 = math.rsqrt %125 : vector<16x1xf32>
    %127 = vector.broadcast %126 : vector<16x1xf32> to vector<16x32xf32>
    %128 = arith.mulf %123, %127 : vector<16x32xf32>
    %129 = vector.broadcast %108 : vector<1x32xf32> to vector<16x32xf32>
    %130 = arith.mulf %128, %129 : vector<16x32xf32>
    %131 = vector.broadcast %110 : vector<1x32xf32> to vector<16x32xf32>
    %132 = arith.addf %130, %131 : vector<16x32xf32>
    %c0_48 = arith.constant 0 : index
    %c0_49 = arith.constant 0 : index
    %c0_50 = arith.constant 0 : index
    %133 = vector.load %arg11[%c0_48, %c0_49, %c0_50] : memref<1x32x64xf32, #tpu.memory_space<vmem>>, vector<1x32x64xf32>
    %134 = vector.shape_cast %133 : vector<1x32x64xf32> to vector<32x64xf32>
    %cst_51 = arith.constant dense<0.000000e+00> : vector<16x64xf32>
    %135 = tpu.matmul %132, %134, %cst_51 {dimension_numbers = #tpu.dot_dimension_numbers<[1], [0], [0], [1], [0, 0, 1, 1], [], []>} : vector<16x32xf32>, vector<32x64xf32>, vector<16x64xf32> -> vector<16x64xf32>
    %c0_52 = arith.constant 0 : index
    %c0_53 = arith.constant 0 : index
    %c0_54 = arith.constant 0 : index
    %136 = vector.load %arg12[%c0_52, %c0_53, %c0_54] : memref<1x1x64xf32, #tpu.memory_space<vmem>>, vector<1x1x64xf32>
    %137 = vector.shape_cast %136 : vector<1x1x64xf32> to vector<1x64xf32>
    %138 = vector.broadcast %137 : vector<1x64xf32> to vector<16x64xf32>
    %139 = arith.addf %135, %138 : vector<16x64xf32>
    %cst_55 = arith.constant 5.000000e-01 : f32
    %140 = vector.broadcast %cst_55 : f32 to vector<16x64xf32>
    %141 = arith.mulf %140, %139 : vector<16x64xf32>
    %cst_56 = arith.constant 4.471500e-02 : f32
    %142 = vector.broadcast %cst_56 : f32 to vector<16x64xf32>
    %143 = arith.mulf %142, %139 : vector<16x64xf32>
    %144 = arith.mulf %143, %139 : vector<16x64xf32>
    %145 = arith.mulf %144, %139 : vector<16x64xf32>
    %146 = arith.addf %139, %145 : vector<16x64xf32>
    %cst_57 = arith.constant 0.797884583 : f32
    %147 = vector.broadcast %cst_57 : f32 to vector<16x64xf32>
    %148 = arith.mulf %147, %146 : vector<16x64xf32>
    %149 = math.tanh %148 : vector<16x64xf32>
    %cst_58 = arith.constant 1.000000e+00 : f32
    %150 = vector.broadcast %cst_58 : f32 to vector<16x64xf32>
    %151 = arith.addf %150, %149 : vector<16x64xf32>
    %152 = arith.mulf %141, %151 : vector<16x64xf32>
    %c0_59 = arith.constant 0 : index
    %c0_60 = arith.constant 0 : index
    %c0_61 = arith.constant 0 : index
    %153 = vector.load %arg13[%c0_59, %c0_60, %c0_61] : memref<1x64x32xf32, #tpu.memory_space<vmem>>, vector<1x64x32xf32>
    %154 = vector.shape_cast %153 : vector<1x64x32xf32> to vector<64x32xf32>
    %cst_62 = arith.constant dense<0.000000e+00> : vector<16x32xf32>
    %155 = tpu.matmul %152, %154, %cst_62 {dimension_numbers = #tpu.dot_dimension_numbers<[1], [0], [0], [1], [0, 0, 1, 1], [], []>} : vector<16x64xf32>, vector<64x32xf32>, vector<16x32xf32> -> vector<16x32xf32>
    %c0_63 = arith.constant 0 : index
    %c0_64 = arith.constant 0 : index
    %c0_65 = arith.constant 0 : index
    %156 = vector.load %arg14[%c0_63, %c0_64, %c0_65] : memref<1x1x32xf32, #tpu.memory_space<vmem>>, vector<1x1x32xf32>
    %157 = vector.shape_cast %156 : vector<1x1x32xf32> to vector<1x32xf32>
    %158 = vector.broadcast %157 : vector<1x32xf32> to vector<16x32xf32>
    %159 = arith.addf %155, %158 : vector<16x32xf32>
    %160 = arith.addf %159, %132 : vector<16x32xf32>
    %c0_66 = arith.constant 0 : index
    %c0_67 = arith.constant 0 : index
    %c0_68 = arith.constant 0 : index
    %161 = vector.load %arg15[%c0_66, %c0_67, %c0_68] : memref<1x1x32xf32, #tpu.memory_space<vmem>>, vector<1x1x32xf32>
    %162 = vector.shape_cast %161 : vector<1x1x32xf32> to vector<1x32xf32>
    %c0_69 = arith.constant 0 : index
    %c0_70 = arith.constant 0 : index
    %c0_71 = arith.constant 0 : index
    %163 = vector.load %arg16[%c0_69, %c0_70, %c0_71] : memref<1x1x32xf32, #tpu.memory_space<vmem>>, vector<1x1x32xf32>
    %164 = vector.shape_cast %163 : vector<1x1x32xf32> to vector<1x32xf32>
    %cst_72 = arith.constant dense<0.000000e+00> : vector<16xf32>
    %165 = vector.multi_reduction <add>, %160, %cst_72 [1] : vector<16x32xf32> to vector<16xf32>
    %166 = vector.shape_cast %165 : vector<16xf32> to vector<16x1xf32>
    %cst_73 = arith.constant 3.200000e+01 : f32
    %167 = vector.broadcast %cst_73 : f32 to vector<16x1xf32>
    %168 = arith.divf %166, %167 : vector<16x1xf32>
    %169 = vector.broadcast %168 : vector<16x1xf32> to vector<16x32xf32>
    %170 = arith.subf %160, %169 : vector<16x32xf32>
    %171 = arith.mulf %170, %170 : vector<16x32xf32>
    %cst_74 = arith.constant dense<0.000000e+00> : vector<16xf32>
    %172 = vector.multi_reduction <add>, %171, %cst_74 [1] : vector<16x32xf32> to vector<16xf32>
    %173 = vector.shape_cast %172 : vector<16xf32> to vector<16x1xf32>
    %cst_75 = arith.constant 3.200000e+01 : f32
    %174 = vector.broadcast %cst_75 : f32 to vector<16x1xf32>
    %175 = arith.divf %173, %174 : vector<16x1xf32>
    %176 = vector.broadcast %168 : vector<16x1xf32> to vector<16x32xf32>
    %177 = arith.subf %160, %176 : vector<16x32xf32>
    %cst_76 = arith.constant 9.99999974E-6 : f32
    %178 = vector.broadcast %cst_76 : f32 to vector<16x1xf32>
    %179 = arith.addf %175, %178 : vector<16x1xf32>
    %180 = math.rsqrt %179 : vector<16x1xf32>
    %181 = vector.broadcast %180 : vector<16x1xf32> to vector<16x32xf32>
    %182 = arith.mulf %177, %181 : vector<16x32xf32>
    %183 = vector.broadcast %162 : vector<1x32xf32> to vector<16x32xf32>
    %184 = arith.mulf %182, %183 : vector<16x32xf32>
    %185 = vector.broadcast %164 : vector<1x32xf32> to vector<16x32xf32>
    %186 = arith.addf %184, %185 : vector<16x32xf32>
    %c0_77 = arith.constant 0 : index
    %c0_78 = arith.constant 0 : index
    %187 = vector.load %arg17[%c0_77, %c0_78] : memref<16x32xf32, #tpu.memory_space<vmem>>, vector<16x32xf32>
    tpu.vector_store %arg17[%c0_77, %c0_78], %186 {strides = array<i32>} : memref<16x32xf32, #tpu.memory_space<vmem>>, vector<16x32xf32>,
    return
  }
  func.func @transform_0(%arg0: i32) -> (i32, i32) {
    %c0_i32 = arith.constant 0 : i32
    %c0_i32_0 = arith.constant 0 : i32
    %c0_i32_1 = arith.constant 0 : i32
    return %c0_i32, %c0_i32_0 : i32, i32
  }
  func.func @transform_1(%arg0: i32) -> (i32, i32) {
    %c0_i32 = arith.constant 0 : i32
    %c0_i32_0 = arith.constant 0 : i32
    %c0_i32_1 = arith.constant 0 : i32
    return %c0_i32, %c0_i32_0 : i32, i32
  }
  func.func @transform_2(%arg0: i32) -> (i32, i32) {
    %c0_i32 = arith.constant 0 : i32
    %c0_i32_0 = arith.constant 0 : i32
    %c0_i32_1 = arith.constant 0 : i32
    return %c0_i32, %c0_i32_0 : i32, i32
  }
  func.func @transform_3(%arg0: i32) -> (i32, i32) {
    %c0_i32 = arith.constant 0 : i32
    %c0_i32_0 = arith.constant 0 : i32
    %c0_i32_1 = arith.constant 0 : i32
    return %c0_i32, %c0_i32_0 : i32, i32
  }
  func.func @transform_4(%arg0: i32) -> (i32, i32, i32) {
    %c0_i32 = arith.constant 0 : i32
    %c0_i32_0 = arith.constant 0 : i32
    %c0_i32_1 = arith.constant 0 : i32
    return %arg0, %c0_i32, %c0_i32_0 : i32, i32, i32
  }
  func.func @transform_5(%arg0: i32) -> (i32, i32, i32) {
    %c0_i32 = arith.constant 0 : i32
    %c0_i32_0 = arith.constant 0 : i32
    %c0_i32_1 = arith.constant 0 : i32
    return %arg0, %c0_i32, %c0_i32_0 : i32, i32, i32
  }
  func.func @transform_6(%arg0: i32) -> (i32, i32, i32) {
    %c0_i32 = arith.constant 0 : i32
    %c0_i32_0 = arith.constant 0 : i32
    %c0_i32_1 = arith.constant 0 : i32
    return %arg0, %c0_i32, %c0_i32_0 : i32, i32, i32
  }
  func.func @transform_7(%arg0: i32) -> (i32, i32, i32) {
    %c0_i32 = arith.constant 0 : i32
    %c0_i32_0 = arith.constant 0 : i32
    %c0_i32_1 = arith.constant 0 : i32
    return %arg0, %c0_i32, %c0_i32_0 : i32, i32, i32
  }
  func.func @transform_8(%arg0: i32) -> (i32, i32, i32) {
    %c0_i32 = arith.constant 0 : i32
    %c0_i32_0 = arith.constant 0 : i32
    %c0_i32_1 = arith.constant 0 : i32
    return %arg0, %c0_i32, %c0_i32_0 : i32, i32, i32
  }
  func.func @transform_9(%arg0: i32) -> (i32, i32, i32) {
    %c0_i32 = arith.constant 0 : i32
    %c0_i32_0 = arith.constant 0 : i32
    %c0_i32_1 = arith.constant 0 : i32
    return %arg0, %c0_i32, %c0_i32_0 : i32, i32, i32
  }
  func.func @transform_10(%arg0: i32) -> (i32, i32, i32) {
    %c0_i32 = arith.constant 0 : i32
    %c0_i32_0 = arith.constant 0 : i32
    %c0_i32_1 = arith.constant 0 : i32
    return %arg0, %c0_i32, %c0_i32_0 : i32, i32, i32
  }
  func.func @transform_11(%arg0: i32) -> (i32, i32, i32) {
    %c0_i32 = arith.constant 0 : i32
    %c0_i32_0 = arith.constant 0 : i32
    %c0_i32_1 = arith.constant 0 : i32
    return %arg0, %c0_i32, %c0_i32_0 : i32, i32, i32
  }
  func.func @transform_12(%arg0: i32) -> (i32, i32, i32) {
    %c0_i32 = arith.constant 0 : i32
    %c0_i32_0 = arith.constant 0 : i32
    %c0_i32_1 = arith.constant 0 : i32
    return %arg0, %c0_i32, %c0_i32_0 : i32, i32, i32
  }
  func.func @transform_13(%arg0: i32) -> (i32, i32, i32) {
    %c0_i32 = arith.constant 0 : i32
    %c0_i32_0 = arith.constant 0 : i32
    %c0_i32_1 = arith.constant 0 : i32
    return %arg0, %c0_i32, %c0_i32_0 : i32, i32, i32
  }
  func.func @transform_14(%arg0: i32) -> (i32, i32, i32) {
    %c0_i32 = arith.constant 0 : i32
    %c0_i32_0 = arith.constant 0 : i32
    %c0_i32_1 = arith.constant 0 : i32
    return %arg0, %c0_i32, %c0_i32_0 : i32, i32, i32
  }
  func.func @transform_15(%arg0: i32) -> (i32, i32, i32) {
    %c0_i32 = arith.constant 0 : i32
    %c0_i32_0 = arith.constant 0 : i32
    %c0_i32_1 = arith.constant 0 : i32
    return %arg0, %c0_i32, %c0_i32_0 : i32, i32, i32
  }
  func.func @transform_16(%arg0: i32) -> (i32, i32) {
    %c0_i32 = arith.constant 0 : i32
    %c0_i32_0 = arith.constant 0 : i32
    %c0_i32_1 = arith.constant 0 : i32
    return %c0_i32, %c0_i32_0 : i32, i32
  }
}

</mosaic_0001>

<bundles_post_ra>
// kernel: single_head_roberta_forward.1
= control target key start
LH: loop header
LB: loop body
LE: loop exit
PB: predicated region body
PF: predicated region fallthrough
CT: control target
= control target key end

     0   :  { %s2415_s21 = smov 0   ;;  %s2667_s0 = inlined_call_operand.vmem [shape: f32[16,32], index: 0, kind: input, shape index: {}]   ;;  %s2668_s1 = inlined_call_operand.vmem [shape: f32[2,8], index: 1, kind: input, shape index: {}]   ;;  %s2669_s2 = inlined_call_operand.vmem [shape: f32[1,32], index: 2, kind: input, shape index: {}]   ;;  %s2670_s3 = inlined_call_operand.vmem [shape: f32[1,32], index: 3, kind: input, shape index: {}]   ;;  %s2671_s4 = inlined_call_operand.vmem [shape: f32[2,32,96], index: 4, kind: input, shape index: {}]   ;;  %s2672_s5 = inlined_call_operand.vmem [shape: f32[2,1,96], index: 5, kind: input, shape index: {}]   ;;  %s2673_s6 = inlined_call_operand.vmem [shape: f32[2,32,32], index: 6, kind: input, shape index: {}]   ;;  %s2674_s7 = inlined_call_operand.vmem [shape: f32[2,1,32], index: 7, kind: input, shape index: {}]   ;;  %s2675_s8 = inlined_call_operand.vmem [shape: f32[2,1,32], index: 8, kind: input, shape index: {}]   ;;  %s2676_s9 = inlined_call_operand.vmem [shape: f32[2,1,32], index: 9, kind: input, shape index: {}]   ;;  %s2677_s10 = inlined_call_operand.vmem [shape: f32[2,32,64], index: 10, kind: input, shape index: {}]   ;;  %s2678_s11 = inlined_call_operand.vmem [shape: f32[2,1,64], index: 11, kind: input, shape index: {}]   ;;  %s2679_s12 = inlined_call_operand.vmem [shape: f32[2,64,32], index: 12, kind: input, shape index: {}]   ;;  %s2680_s13 = inlined_call_operand.vmem [shape: f32[2,1,32], index: 13, kind: input, shape index: {}]   ;;  %s2681_s14 = inlined_call_operand.vmem [shape: f32[2,1,32], index: 14, kind: input, shape index: {}]   ;;  %s2682_s15 = inlined_call_operand.vmem [shape: f32[2,1,32], index: 15, kind: input, shape index: {}]   ;;  %s2683_s16 = inlined_call_operand.vmem [shape: f32[16,32], index: 16, kind: output, shape index: {}]  }
   0x1   :  { %2689 = sst [smem:[#allocation4_spill]] %s2667_s0 }
   0x2   :  { %2690 = sst [smem:[#allocation5_spill]] %s2668_s1 }
   0x3   :  { %2691 = sst [smem:[#allocation6_spill]] %s2670_s3 }
   0x4   :  { %2692 = sst [smem:[#allocation7_spill]] %s2671_s4 }
   0x5   :  { %2693 = sst [smem:[#allocation8_spill]] %s2673_s6 }
   0x6   :  { %2694 = sst [smem:[#allocation9_spill]] %s2683_s16 }
   0x7 LB: > { %2695 = sst [smem:[#allocation2_spill]] %s2320_s21  ;;  %s2041_s22 = sadd.s32 4294967295, %s2320_s21   ;;  %s2320_s21 = sphi %s2415_s21, %s26_s21  }
   0x8   : > { %p2044_p0 = scmp.ge.s32.totalorder %s2320_s21, 1  ;;  %p551_p1 = scmp.lt.s32.totalorder %s2320_s21, 3 }
   0xa   : > { %p552_p2 = pnand %p2044_p0, %p551_p1 }
   0xc   : > { %555 = sbr.rel (%p552_p2) target bundleno = 2869 (0xb35), region = 84 }
  0x13   : > { %p635_p3 = scmp.lt.s32.totalorder %s2041_s22, 1  ;;  %s2696_s4 = sld [smem:[#allocation7_spill]] }
  0x14   : > { %s2697_s6 = sld [smem:[#allocation8_spill]]  ;;  %p2053_p4 = scmp.ne.s32.totalorder %s2041_s22, 0 }
  0x15   : > { %s2423_s23 = scalar_select %p635_p3, %s2041_s22, 1 }
  0x16   : > { %682 = sbr.rel (%p2053_p4) target bundleno = 351 (0x15f), region = 88  ;;  %vm687_vm0 = vcmask (!%p2053_p4), 261120   ;;  %v2054_v21 = vld [vmem:[%s2669_s2] ss:$0 sm:$0xff] (!%p2053_p4)  ;;  %s2700_s16 = sld [smem:[#allocation6_spill]] (!%p2053_p4) }
  0x17   : > { %s2086_s24 = sshll.u32 %s2423_s23, 5  ;;  %s672_s25 = scalar_lea.vmem %s2680_s13, %s2423_s23 }
  0x18   : > { %s675_s28 = scalar_lea.vmem %s2681_s14, %s2423_s23  ;;  %s678_s3 = scalar_lea.vmem %s2682_s15, %s2423_s23 }
  0x19   : > { %s2433_s30 = scalar_lea.vmem %s2696_s4, %s2086_s24  ;;  %s2455_s4 = scalar_lea.vmem %s2677_s10, %s2086_s24 }
  0x1a   : > { %s2438_s18 = scalar_lea.vmem %s2697_s6, %s2086_s24  ;;  %s2699_s6 = sld [smem:[#allocation4_spill]] (!%p2053_p4) }
  0x1b   : > { %2698 = sst [smem:[#allocation3_spill]] %s2438_s18  ;;  %s2089_s18 = sshll.u32 %s2423_s23, 6 }
  0x1c   : > { %s2465_s21 = scalar_lea.vmem %s2679_s12, %s2089_s18  ;;  %v2055_v23 = vld [vmem:[%s2700_s16] ss:$0 sm:$0xff] (!%p2053_p4)  ;;  %s2701_s29 = sld [smem:[#allocation9_spill]] (!%p2053_p4) }
  0x20   : > { %v683_v0 = vld [vmem:[%s2699_s6] sm:$0xff]  ;;  %v684_v1 = vld [vmem:[%s2699_s6 + $0x8] sm:$0xff] }
  0x21   : > { %v688_v2 = vsel %vm687_vm0, %v683_v0, 0.0  ;;  %v691_v3 = vsel %vm687_vm0, %v684_v1, 0.0 }
  0x22   : > { %689 = vadd.xlane.f32.xlu0 %v688_v2 }
  0x26   : > { %692 = vadd.xlane.f32.xlu0 %v691_v3 }
  0xaf   : > { %v690_v4 = vpop.xlane.xlu0 %689 }
  0xb0   : > { %v695_v5 = vmul.f32 0.03125, %v690_v4 }
  0xb2   : > { %v697_v6 = vsub.f32 %v683_v0, %v695_v5 }
  0xb3   : > { %v693_v7 = vpop.xlane.xlu0 %692 }
  0xb4   : > { %v696_v8 = vmul.f32 0.03125, %v693_v7  ;;  %v699_v9 = vmul.f32 %v697_v6, %v697_v6 }
  0xb6   : > { %v698_v10 = vsub.f32 %v684_v1, %v696_v8  ;;  %v701_v11 = vsel %vm687_vm0, %v699_v9, 0.0 }
  0xb7   : > { %702 = vadd.xlane.f32.xlu1 %v701_v11 }
  0xb8   : > { %v700_v12 = vmul.f32 %v698_v10, %v698_v10 }
  0xba   : > { %v704_v13 = vsel %vm687_vm0, %v700_v12, 0.0 }
  0xbb   : > { %705 = vadd.xlane.f32.xlu1 %v704_v13 }
 0x144   : > { %v703_v14 = vpop.xlane.xlu1 %702 }
 0x145   : > { %v707_v15 = vmul.f32 0.03125, %v703_v14 }
 0x147   : > { %v709_v16 = vadd.f32 1e-05, %v707_v15 }
 0x148   : > { %v706_v17 = vpop.xlane.xlu1 %705 }
 0x149   : > { %2282 = vrsqrt.f32 %v709_v16  ;;  %v708_v18 = vmul.f32 0.03125, %v706_v17 }
 0x14b   : > { %v710_v19 = vadd.f32 1e-05, %v708_v18 }
 0x14d   : > { %2284 = vrsqrt.f32 %v710_v19 }
 0x153   : > { %v2283_v20 = vpop.eup %2282 }
 0x154   : > { %v713_v22 = vmul.f32 %v2283_v20, %v697_v6 }
 0x156   : > { %v721_v24 = vmul.f32 %v2054_v21, %v713_v22 }
 0x157   : > { %v2285_v25 = vpop.eup %2284 }
 0x158   : > { %v729_v26 = vadd.f32 %v2055_v23, %v721_v24  ;;  %v714_v27 = vmul.f32 %v2285_v25, %v698_v10 }
 0x15a   : > { %731 = vst.msk [vmem:[%s2701_s29] sm:$0xff] %vm687_vm0, %v729_v26  ;;  %v722_v28 = vmul.f32 %v2054_v21, %v714_v27 }
 0x15c   : > { %v730_v29 = vadd.f32 %v2055_v23, %v722_v28 }
 0x15e   : > { %732 = vst.msk [vmem:[%s2701_s29 + $0x8] sm:$0xff] %vm687_vm0, %v730_v29 }
 0x15f PF: > { %v735_v30 = vld [vmem:[%s2433_s30] sm:$0xff]  ;;  %v736_v31 = vld [vmem:[%s2433_s30 + $0x8] sm:$0xff]  ;;  %v737_v32 = vld [vmem:[%s2433_s30 + $0x10] sm:$0xff]  ;;  %vm746_vm1 = vcmask 261120   ;;  %s2702_s22 = sld [smem:[#allocation9_spill]]  ;;  %v2322_v38 = vmov 0.0   ;;  %s2703_s16 = scalar_lea.vmem %s2672_s5, %s2423_s23  ;;  %v830_v52 = vlaneseq }
 0x160   : > { %v2226_v33 = vpack.c.bf16 %v736_v31, %v735_v30  ;;  %v738_v34 = vld [vmem:[%s2433_s30 + $0x18] sm:$0xff]  ;;  %2155 = vmatprep.subr.mxu0 %v2322_v38  ;;  %vm2323_vm2 = vmmov 0   ;;  %v2056_v39 = vld [vmem:[%s2703_s16] ss:$0 sm:$0xff]  ;;  %s2324_s26 = smov 96   ;;  %s2325_s24 = smov 112  }
 0x161   : > { %v2230_v36 = vpack.c.bf16 %v738_v34, %v737_v32  ;;  %2157 = vmatprep.mubr.msk.f32.mxu0 %vm2323_vm2, %v2322_v38  ;;  %s2326_s29 = smov 80   ;;  %vm837_vm3 = vcmask 130048   ;;  %v831_v53 = vshrl.u32 %v830_v52, 7  ;;  %s2704_s18 = sld [smem:[#allocation5_spill]]  ;;  %vm913_vm4 = vcmask 64512  }
 0x162   : > { %2227 = vmatprep.subr.bf16.mxu1 %v2226_v33  ;;  %s2327_s19 = smov 64   ;;  %s2328_s27 = smov 48   ;;  %vm1775_vm5 = vcmask 523264  }
 0x163   : > { %2229 = vmatpush3.bf16.msra.mxu1 %v2226_v33  ;;  %v832_v54 = vsub.s32 0, %v831_v53  ;;  %v1174_v60 = vsub.s32 1, %v831_v53  ;;  %s2705_s20 = sld [smem:[#allocation3_spill]]  ;;  %s2329_s30 = smov 16  }
 0x164   : > { %2231 = vmatprep.subr.bf16.mxu1 %v2230_v36  ;;  %s2707_s0 = scalar_lea.vmem %s2675_s8, %s2423_s23 }
 0x165   : > { %v2510_v35 = vld [vmem:[%s2702_s22] sm:$0xff]  ;;  %v2517_v37 = vld [vmem:[%s2702_s22 + $0x8] sm:$0xff] }
 0x166   : > { %2142 = vmatprep.mubr.msk.f32.mxu1 %vm746_vm1, %v2510_v35 }
 0x167   : > { %2233 = vmatpush3.bf16.msra.mxu1 %v2230_v36  ;;  %v828_v55 = vld [vmem:[%s2704_s18] sm:$0x3]  ;;  %s2708_s18 = scalar_lea.vmem %s2676_s9, %s2423_s23 }
 0x168   : > { %2145 = vmatprep.subr.mxu1 %v2322_v38  ;;  %v833_v56 = vrot.slane %v828_v55, %v832_v54  ;;  %v1175_v1 = vrot.slane %v828_v55, %v1174_v60 }
 0x169   : > { %v1513_v53 = vld [vmem:[%s2705_s20 + $0x10] sm:$0xff]  ;;  %v1514_v54 = vld [vmem:[%s2705_s20 + $0x18] sm:$0xff] }
 0x16a   : > { %2143 = vmatmul.mubr.msk.f32.vlgmr.msra.gmra.mrb[0].mxu1 %vm746_vm1, %v2517_v37  ;;  %v2238_v55 = vpack.c.bf16 %v1514_v54, %v1513_v53  ;;  %v1766_v54 = vld [vmem:[%s2465_s21 + $0x30] sm:$0xff] }
 0x16b   : > { %2147 = vmatprep.mubr.msk.f32.mxu1 %vm2323_vm2, %v2322_v38 }
 0x23d   : > { %v2144_v40 = vpop.f32.mrb[0].mxu1 }
 0x23e   : > { %v819_v41 = vpop.f32.mrb[1].mxu1  ;;  %v2536_v44 = vadd.f32 %v2144_v40, %v2056_v39 }
 0x23f   : > { %v2532_v42 = vadd.f32 %v2056_v39, %v819_v41 }
 0x240   : > { %v1171_v45 = vmul.f32 0.25, %v2536_v44 }
 0x241   : > { %835 = vrot.lane.b32.xlu0 %v2532_v42, %s2324_s26  ;;  %v829_v43 = vmul.f32 0.25, %v2532_v42 }
 0x243   : > { %1001 = vrot.lane.b32.xlu1 %v829_v43, %s2325_s24 }
 0x245   : > { %1003 = vrot.lane.b32.xlu0 %v2532_v42, %s2326_s29 }
 0x247   : > { %1177 = vrot.lane.b32.xlu1 %v2536_v44, %s2324_s26  ;;  %s2706_s26 = scalar_lea.vmem %s2674_s7, %s2423_s23 }
 0x249   : > { %1343 = vrot.lane.b32.xlu0 %v2536_v44, %s2326_s29 }
 0x24b   : > { %1341 = vrot.lane.b32.xlu1 %v1171_v45, %s2325_s24 }
 0x2b3   : > { %v836_v46 = vpop.permute.xlu0 %835 }
 0x2b4   : > { %2146 = vmatpush3.xpose.msk.msra.mxu1 %vm837_vm3, %v836_v46 }
 0x2b5   : > { %v1002_v47 = vpop.permute.xlu1 %1001  ;;  %2150 = vmatprep.subr.mxu1 %v2322_v38 }
 0x2b7   : > { %v1004_v48 = vpop.permute.xlu0 %1003  ;;  %2148 = vmatmul.mubr.msk.f32.vlgmr.msra.gmra.mrb[2].mxu1 %vm837_vm3, %v829_v43 }
 0x2b8   : > { %2156 = vmatpush3.xpose.msk.msra.mxu0 %vm837_vm3, %v1004_v48  ;;  %2152 = vmatprep.mubr.msk.f32.mxu1 %vm2323_vm2, %v2322_v38 }
 0x2b9   : > { %2165 = vmatprep.subr.mxu0 %v2322_v38  ;;  %v1178_v49 = vpop.permute.xlu1 %1177 }
 0x2bb   : > { %2158 = vmatmul.mubr.msk.f32.vlgmr.msra.gmra.mrb[0].mxu0 %vm837_vm3, %v1002_v47  ;;  %v1344_v50 = vpop.permute.xlu0 %1343 }
 0x2bc   : > { %2166 = vmatpush3.xpose.msk.msra.mxu0 %vm837_vm3, %v1178_v49  ;;  %2167 = vmatprep.mubr.msk.f32.mxu0 %vm2323_vm2, %v2322_v38 }
 0x2bd   : > { %2175 = vmatprep.subr.mxu0 %v2322_v38  ;;  %v1342_v51 = vpop.permute.xlu1 %1341 }
 0x2bf   : > { %2168 = vmatmul.mubr.msk.f32.vlgmr.msra.gmra.mrb[2].mxu0 %vm837_vm3, %v1171_v45 }
 0x2c0   : > { %2176 = vmatpush3.xpose.msk.msra.mxu0 %vm837_vm3, %v1344_v50  ;;  %2177 = vmatprep.mubr.msk.f32.mxu0 %vm2323_vm2, %v2322_v38  ;;  %v1511_v50 = vld [vmem:[%s2705_s20] sm:$0xff] }
 0x2c3   : > { %2178 = vmatmul.mubr.msk.f32.vlgmr.msra.gmra.mrb[4].mxu0 %vm837_vm3, %v1342_v51  ;;  %v1512_v51 = vld [vmem:[%s2705_s20 + $0x8] sm:$0xff]  ;;  %s2709_s20 = scalar_lea.vmem %s2678_s11, %s2423_s23 }
 0x2c4   : > { %v2234_v52 = vpack.c.bf16 %v1512_v51, %v1511_v50  ;;  %v1764_v51 = vld [vmem:[%s2465_s21 + $0x20] sm:$0xff] }
 0x2c6   : > { %2235 = vmatprep.subr.bf16.mxu0 %v2234_v52 }
 0x2c7   : > { %2237 = vmatpush3.bf16.msra.mxu0 %v2234_v52  ;;  %v1765_v52 = vld [vmem:[%s2465_s21 + $0x28] sm:$0xff] }
 0x2c8   : > { %2239 = vmatprep.subr.bf16.mxu0 %v2238_v55  ;;  %v2258_v53 = vpack.c.bf16 %v1765_v52, %v1764_v51 }
 0x2cb   : > { %2241 = vmatpush3.bf16.msra.mxu0 %v2238_v55  ;;  %v1767_v55 = vld [vmem:[%s2465_s21 + $0x38] sm:$0xff] }
 0x38a   : > { %v909_v57 = vpop.f32.mrb[2].mxu1 }
 0x38b   : > { %v910_v58 = vadd.f32 %v909_v57, %v833_v56  ;;  %v2149_v59 = vpop.f32.mrb[3].mxu1 }
 0x38d   : > { %v914_v61 = vsel %vm913_vm4, %v910_v58, -inf }
 0x38e   : > { %v1075_v62 = vpop.f32.mrb[0].mxu0  ;;  %915 = vmax.xlane.f32.xlu0 %v914_v61 }
 0x38f   : > { %v1076_v63 = vadd.f32 %v1075_v62, %v833_v56  ;;  %v2159_v0 = vpop.f32.mrb[1].mxu0 }
 0x391   : > { %v1079_v2 = vsel %vm913_vm4, %v1076_v63, -inf }
 0x392   : > { %1080 = vmax.xlane.f32.xlu1 %v1079_v2  ;;  %v1250_v3 = vpop.f32.mrb[2].mxu0 }
 0x393   : > { %v1251_v4 = vadd.f32 %v1250_v3, %v1175_v1  ;;  %v2169_v5 = vpop.f32.mrb[3].mxu0  ;;  %v2071_v3 = vld [vmem:[%s2706_s26] ss:$0 sm:$0xff] }
 0x395   : > { %v1254_v6 = vsel %vm913_vm4, %v1251_v4, -inf }
 0x396   : > { %v1415_v7 = vpop.f32.mrb[4].mxu0  ;;  %1255 = vmax.xlane.f32.xlu0 %v1254_v6 }
 0x397   : > { %v1416_v8 = vadd.f32 %v1415_v7, %v1175_v1  ;;  %v2179_v9 = vpop.f32.mrb[5].mxu0 }
 0x399   : > { %v1419_v10 = vsel %vm913_vm4, %v1416_v8, -inf }
 0x39a   : > { %1420 = vmax.xlane.f32.xlu0 %v1419_v10 }
 0x3a3   : > { %925 = vrot.lane.b32.xlu1 %v2532_v42, %s2327_s19 }
 0x41b   : > { %v916_v11 = vpop.xlane.xlu0 %915 }
 0x41c   : > { %v917_v12 = vsub.f32 %v910_v58, %v916_v11 }
 0x41e   : > { %v918_v13 = vmul.f32 1.442695, %v917_v12 }
 0x41f   : > { %v1081_v14 = vpop.xlane.xlu1 %1080 }
 0x420   : > { %2286 = vpow2.f32 %v918_v13  ;;  %v1082_v15 = vsub.f32 %v1076_v63, %v1081_v14 }
 0x422   : > { %v1083_v16 = vmul.f32 1.442695, %v1082_v15 }
 0x423   : > { %v926_v17 = vpop.permute.xlu1 %925  ;;  %v1256_v18 = vpop.xlane.xlu0 %1255 }
 0x424   : > { %2288 = vpow2.f32 %v1083_v16  ;;  %v1257_v19 = vsub.f32 %v1251_v4, %v1256_v18  ;;  %2151 = vmatpush3.msra.mxu1 %v926_v17 }
 0x425   : > { %2160 = vmatprep.subr.mxu1 %v2322_v38 }
 0x426   : > { %v1258_v20 = vmul.f32 1.442695, %v1257_v19 }
 0x427   : > { %v1421_v21 = vpop.xlane.xlu0 %1420 }
 0x428   : > { %2290 = vpow2.f32 %v1258_v20  ;;  %v1422_v22 = vsub.f32 %v1416_v8, %v1421_v21  ;;  %v1650_v20 = vld [vmem:[%s2455_s4] sm:$0xff]  ;;  %v1651_v21 = vld [vmem:[%s2455_s4 + $0x8] sm:$0xff] }
 0x42a   : > { %v2287_v23 = vpop.eup %2286  ;;  %v1423_v24 = vmul.f32 1.442695, %v1422_v22  ;;  %v2242_v22 = vpack.c.bf16 %v1651_v21, %v1650_v20 }
 0x42b   : > { %v920_v25 = vsel %vm913_vm4, %v2287_v23, 0.0 }
 0x42c   : > { %2292 = vpow2.f32 %v1423_v24  ;;  %921 = vadd.xlane.f32.xlu1 %v920_v25  ;;  %v1653_v24 = vld [vmem:[%s2455_s4 + $0x18] sm:$0xff] }
 0x42e   : > { %v2289_v26 = vpop.eup %2288 }
 0x42f   : > { %v1085_v27 = vsel %vm913_vm4, %v2289_v26, 0.0 }
 0x430   : > { %1086 = vadd.xlane.f32.xlu0 %v1085_v27 }
 0x432   : > { %v2291_v28 = vpop.eup %2290 }
 0x433   : > { %v1260_v29 = vsel %vm913_vm4, %v2291_v28, 0.0 }
 0x434   : > { %1261 = vadd.xlane.f32.xlu1 %v1260_v29 }
 0x436   : > { %v2293_v30 = vpop.eup %2292 }
 0x437   : > { %v1425_v31 = vsel %vm913_vm4, %v2293_v30, 0.0 }
 0x438   : > { %1426 = vadd.xlane.f32.xlu0 %v1425_v31 }
 0x445   : > { %1265 = vrot.lane.b32.xlu1 %v2536_v44, %s2327_s19 }
 0x449   : > { %1430 = vrot.lane.b32.xlu1 %v2536_v44, %s2328_s27 }
 0x44e   : > { %1090 = vrot.lane.b32.xlu0 %v2532_v42, %s2328_s27 }
 0x4b9   : > { %v922_v32 = vpop.xlane.xlu1 %921 }
 0x4ba   : > { %2294 = vrcp.f32 %v922_v32 }
 0x4bd   : > { %v1087_v33 = vpop.xlane.xlu0 %1086 }
 0x4be   : > { %2296 = vrcp.f32 %v1087_v33  ;;  %v2074_v33 = vld [vmem:[%s2707_s0] ss:$0 sm:$0xff] }
 0x4c1   : > { %v1262_v34 = vpop.xlane.xlu1 %1261 }
 0x4c2   : > { %2298 = vrcp.f32 %v1262_v34 }
 0x4c4   : > { %v2295_v36 = vpop.eup %2294 }
 0x4c5   : > { %v924_v39 = vmul.f32 %v2295_v36, %v2287_v23  ;;  %v1427_v40 = vpop.xlane.xlu0 %1426  ;;  %v1266_v44 = vpop.permute.xlu1 %1265  ;;  %v1652_v23 = vld [vmem:[%s2455_s4 + $0x10] sm:$0xff]  ;;  %v2075_v36 = vld [vmem:[%s2708_s18] ss:$0 sm:$0xff] }
 0x4c6   : > { %2300 = vrcp.f32 %v1427_v40  ;;  %v2246_v25 = vpack.c.bf16 %v1653_v24, %v1652_v23 }
 0x4c7   : > { %2153 = vmatmul.mubr.msk.f32.vlgmr.msra.gmra.mrb[4].mxu1 %vm913_vm4, %v924_v39 }
 0x4c8   : > { %v2297_v41 = vpop.eup %2296  ;;  %2162 = vmatprep.mubr.msk.f32.mxu1 %vm2323_vm2, %v2322_v38 }
 0x4c9   : > { %v1089_v43 = vmul.f32 %v2297_v41, %v2289_v26  ;;  %v1091_v45 = vpop.permute.xlu0 %1090  ;;  %v1431_v47 = vpop.permute.xlu1 %1430 }
 0x4ca   : > { %2161 = vmatpush3.msra.mxu1 %v1091_v45 }
 0x4cb   : > { %2163 = vmatmul.mubr.msk.f32.vlgmr.msra.gmra.mrb[6].mxu1 %vm913_vm4, %v1089_v43  ;;  %2170 = vmatprep.subr.mxu1 %v2322_v38 }
 0x4cc   : > { %v2299_v42 = vpop.eup %2298  ;;  %2171 = vmatpush3.msra.mxu1 %v1266_v44  ;;  %2172 = vmatprep.mubr.msk.f32.mxu1 %vm2323_vm2, %v2322_v38 }
 0x4cd   : > { %v1264_v46 = vmul.f32 %v2299_v42, %v2291_v28  ;;  %2180 = vmatprep.subr.mxu1 %v2322_v38  ;;  %v1760_v42 = vld [vmem:[%s2465_s21] sm:$0xff] }
 0x4cf   : > { %2173 = vmatmul.mubr.msk.f32.vlgmr.msra.gmra.mrb[8].mxu1 %vm913_vm4, %v1264_v46  ;;  %v1761_v46 = vld [vmem:[%s2465_s21 + $0x8] sm:$0xff] }
 0x4d0   : > { %v2301_v48 = vpop.eup %2300  ;;  %2181 = vmatpush3.msra.mxu1 %v1431_v47  ;;  %2182 = vmatprep.mubr.msk.f32.mxu1 %vm2323_vm2, %v2322_v38  ;;  %v2250_v47 = vpack.c.bf16 %v1761_v46, %v1760_v42  ;;  %v2083_v42 = vld [vmem:[%s678_s3] ss:$0 sm:$0xff] }
 0x4d1   : > { %v1429_v49 = vmul.f32 %v2301_v48, %v2293_v30  ;;  %2243 = vmatprep.subr.bf16.mxu1 %v2242_v22  ;;  %v1762_v48 = vld [vmem:[%s2465_s21 + $0x10] sm:$0xff] }
 0x4d2   : > { %2251 = vmatprep.subr.bf16.mxu0 %v2250_v47 }
 0x4d3   : > { %2183 = vmatmul.mubr.msk.f32.vlgmr.msra.gmra.mrb[10].mxu1 %vm913_vm4, %v1429_v49  ;;  %v1763_v49 = vld [vmem:[%s2465_s21 + $0x18] sm:$0xff] }
 0x4d4   : > { %2245 = vmatpush3.bf16.msra.mxu1 %v2242_v22  ;;  %v2254_v50 = vpack.c.bf16 %v1763_v49, %v1762_v48 }
 0x4d5   : > { %2247 = vmatprep.subr.bf16.mxu1 %v2246_v25 }
 0x4d8   : > { %2249 = vmatpush3.bf16.msra.mxu1 %v2246_v25 }
 0x59a   : > { %v997_v56 = vpop.f32.mrb[4].mxu1 }
 0x59b   : > { %v2154_v57 = vpop.f32.mrb[5].mxu1 }
 0x59c   : > { %v2076_v57 = vld [vmem:[%s2709_s20] ss:$0 sm:$0xff] }
 0x59e   : > { %v1162_v58 = vpop.f32.mrb[6].mxu1 }
 0x59f   : > { %1167 = vrot.lane.b32.xlu0 %v1162_v58, %s2329_s30  ;;  %v2164_v38 = vpop.f32.mrb[7].mxu1 }
 0x5a2   : > { %v1337_v59 = vpop.f32.mrb[8].mxu1 }
 0x5a3   : > { %v2174_v60 = vpop.f32.mrb[9].mxu1 }
 0x5a6   : > { %v1502_v61 = vpop.f32.mrb[10].mxu1 }
 0x5a7   : > { %1507 = vrot.lane.b32.xlu1 %v1502_v61, %s2329_s30  ;;  %v2184_v62 = vpop.f32.mrb[11].mxu1 }
 0x611   : > { %v1168_v63 = vpop.permute.xlu0 %1167 }
 0x612   : > { %v1170_v0 = vsel %vm837_vm3, %v997_v56, %v1168_v63  ;;  %v2262_v56 = vpack.c.bf16 %v1767_v55, %v1766_v54 }
 0x613   : > { %2193 = vmatprep.mubr.msk.f32.mxu0 %vm746_vm1, %v1170_v0 }
 0x619   : > { %v1508_v1 = vpop.permute.xlu1 %1507 }
 0x61a   : > { %v1510_v2 = vsel %vm837_vm3, %v1337_v59, %v1508_v1 }
 0x61b   : > { %2194 = vmatmul.mubr.msk.f32.vlgmr.msra.gmra.mrb[6].mxu0 %vm746_vm1, %v1510_v2 }
 0x61c   : > { %2253 = vmatpush3.bf16.msra.mxu0 %v2250_v47 }
 0x61d   : > { %2255 = vmatprep.subr.bf16.mxu0 %v2254_v50 }
 0x620   : > { %2257 = vmatpush3.bf16.msra.mxu0 %v2254_v50 }
 0x621   : > { %2259 = vmatprep.subr.bf16.mxu0 %v2258_v53 }
 0x624   : > { %2261 = vmatpush3.bf16.msra.mxu0 %v2258_v53 }
 0x625   : > { %2263 = vmatprep.subr.bf16.mxu0 %v2262_v56 }
 0x628   : > { %2265 = vmatpush3.bf16.msra.mxu0 %v2262_v56 }
 0x6ee   : > { %v2195_v4 = vpop.f32.mrb[6].mxu0 }
 0x6ef   : > { %v1600_v5 = vadd.f32 %v2195_v4, %v2071_v3  ;;  %v1594_v6 = vpop.f32.mrb[7].mxu0 }
 0x6f0   : > { %v1595_v7 = vadd.f32 %v2071_v3, %v1594_v6 }
 0x6f1   : > { %v1604_v8 = vadd.f32 %v1600_v5, %v2517_v37 }
 0x6f2   : > { %v1603_v9 = vadd.f32 %v1595_v7, %v2510_v35 }
 0x6f3   : > { %v1610_v10 = vsel %vm746_vm1, %v1604_v8, 0.0 }
 0x6f4   : > { %1611 = vadd.xlane.f32.xlu1 %v1610_v10  ;;  %v1607_v11 = vsel %vm746_vm1, %v1603_v9, 0.0 }
 0x6f5   : > { %1608 = vadd.xlane.f32.xlu0 %v1607_v11 }
 0x781   : > { %v1612_v12 = vpop.xlane.xlu1 %1611 }
 0x782   : > { %v1615_v13 = vmul.f32 0.03125, %v1612_v12  ;;  %v1609_v14 = vpop.xlane.xlu0 %1608 }
 0x783   : > { %v1614_v15 = vmul.f32 0.03125, %v1609_v14 }
 0x784   : > { %v1617_v16 = vsub.f32 %v1604_v8, %v1615_v13 }
 0x785   : > { %v1616_v17 = vsub.f32 %v1603_v9, %v1614_v15  ;;  %v2079_v15 = vld [vmem:[%s672_s25] ss:$0 sm:$0xff] }
 0x786   : > { %v1619_v35 = vmul.f32 %v1617_v16, %v1617_v16 }
 0x787   : > { %v1618_v18 = vmul.f32 %v1616_v17, %v1616_v17 }
 0x788   : > { %v1623_v19 = vsel %vm746_vm1, %v1619_v35, 0.0 }
 0x789   : > { %v1620_v37 = vsel %vm746_vm1, %v1618_v18, 0.0 }
 0x78a   : > { %1621 = vadd.xlane.f32.xlu0 %v1620_v37 }
 0x78e   : > { %1624 = vadd.xlane.f32.xlu0 %v1623_v19 }
 0x817   : > { %v1622_v26 = vpop.xlane.xlu0 %1621 }
 0x818   : > { %v1626_v27 = vmul.f32 0.03125, %v1622_v26 }
 0x81a   : > { %v1628_v28 = vadd.f32 1e-05, %v1626_v27 }
 0x81b   : > { %v1625_v29 = vpop.xlane.xlu0 %1624 }
 0x81c   : > { %2302 = vrsqrt.f32 %v1628_v28  ;;  %v1627_v30 = vmul.f32 0.03125, %v1625_v29 }
 0x81e   : > { %v1629_v31 = vadd.f32 1e-05, %v1627_v30 }
 0x820   : > { %2304 = vrsqrt.f32 %v1629_v31 }
 0x826   : > { %v2303_v32 = vpop.eup %2302 }
 0x827   : > { %v1632_v34 = vmul.f32 %v2303_v32, %v1616_v17 }
 0x829   : > { %v1640_v39 = vmul.f32 %v2074_v33, %v1632_v34 }
 0x82a   : > { %v2305_v40 = vpop.eup %2304 }
 0x82b   : > { %v1633_v41 = vmul.f32 %v2305_v40, %v1617_v16  ;;  %v1648_v43 = vadd.f32 %v2075_v36, %v1640_v39 }
 0x82d   : > { %v1641_v44 = vmul.f32 %v2074_v33, %v1633_v41  ;;  %2204 = vmatprep.mubr.msk.f32.mxu1 %vm746_vm1, %v1648_v43 }
 0x82f   : > { %v1649_v45 = vadd.f32 %v2075_v36, %v1641_v44 }
 0x831   : > { %2205 = vmatmul.mubr.msk.f32.vlgmr.msra.gmra.mrb[12].mxu1 %vm746_vm1, %v1649_v45 }
 0x904   : > { %v2206_v58 = vpop.f32.mrb[12].mxu1 }
 0x905   : > { %v1739_v38 = vadd.f32 %v2206_v58, %v2076_v57  ;;  %v1733_v59 = vpop.f32.mrb[13].mxu1 }
 0x906   : > { %v1734_v60 = vadd.f32 %v2076_v57, %v1733_v59 }
 0x907   : > { %v1745_v61 = vmul.f32 0.044715, %v1739_v38  ;;  %v1743_v12 = vmul.f32 0.5, %v1739_v38 }
 0x908   : > { %v1744_v62 = vmul.f32 0.044715, %v1734_v60  ;;  %v1742_v10 = vmul.f32 0.5, %v1734_v60 }
 0x909   : > { %v1747_v63 = vmul.f32 %v1745_v61, %v1739_v38 }
 0x90a   : > { %v1746_v0 = vmul.f32 %v1744_v62, %v1734_v60 }
 0x90b   : > { %v1749_v1 = vmul.f32 %v1747_v63, %v1739_v38 }
 0x90c   : > { %v1748_v2 = vmul.f32 %v1746_v0, %v1734_v60 }
 0x90d   : > { %v1751_v3 = vadd.f32 %v1749_v1, %v1739_v38 }
 0x90e   : > { %v1750_v4 = vadd.f32 %v1748_v2, %v1734_v60 }
 0x90f   : > { %v1753_v5 = vmul.f32 0.7978846, %v1751_v3 }
 0x910   : > { %v1752_v6 = vmul.f32 0.7978846, %v1750_v4 }
 0x911   : > { %2306 = vtanh.f32 %v1753_v5 }
 0x912   : > { %2308 = vtanh.f32 %v1752_v6 }
 0x91b   : > { %v2307_v7 = vpop.eup %2306 }
 0x91c   : > { %v2309_v8 = vpop.eup %2308  ;;  %v1757_v9 = vadd.f32 1.0, %v2307_v7 }
 0x91d   : > { %v1756_v11 = vadd.f32 1.0, %v2309_v8 }
 0x91e   : > { %v1759_v14 = vmul.f32 %v1757_v9, %v1743_v12 }
 0x91f   : > { %v1758_v13 = vmul.f32 %v1756_v11, %v1742_v10 }
 0x921   : > { %2223 = vmatprep.mubr.msk.f32.mxu0 %vm1775_vm5, %v1758_v13 }
 0x922   : > { %2224 = vmatmul.mubr.msk.f32.vlgmr.msra.gmra.mrb[8].mxu0 %vm1775_vm5, %v1759_v14 }
 0x9f5   : > { %v2225_v16 = vpop.f32.mrb[8].mxu0 }
 0x9f6   : > { %v1854_v17 = vadd.f32 %v2225_v16, %v2079_v15  ;;  %v1848_v18 = vpop.f32.mrb[9].mxu0 }
 0x9f7   : > { %v1849_v37 = vadd.f32 %v2079_v15, %v1848_v18 }
 0x9f8   : > { %v1858_v35 = vadd.f32 %v1854_v17, %v1649_v45 }
 0x9f9   : > { %v1857_v19 = vadd.f32 %v1849_v37, %v1648_v43  ;;  %v2082_v43 = vld [vmem:[%s675_s28] ss:$0 sm:$0xff] }
 0x9fa   : > { %v1864_v20 = vsel %vm746_vm1, %v1858_v35, 0.0 }
 0x9fb   : > { %1865 = vadd.xlane.f32.xlu0 %v1864_v20  ;;  %v1861_v21 = vsel %vm746_vm1, %v1857_v19, 0.0 }
 0x9fc   : > { %1862 = vadd.xlane.f32.xlu1 %v1861_v21 }
 0xa88   : > { %v1866_v22 = vpop.xlane.xlu0 %1865 }
 0xa89   : > { %v1868_v23 = vmul.f32 0.03125, %v1866_v22  ;;  %v1863_v24 = vpop.xlane.xlu1 %1862 }
 0xa8a   : > { %v1867_v25 = vmul.f32 0.03125, %v1863_v24 }
 0xa8b   : > { %v1870_v26 = vsub.f32 %v1858_v35, %v1868_v23 }
 0xa8c   : > { %v1869_v27 = vsub.f32 %v1857_v19, %v1867_v25 }
 0xa8d   : > { %v1872_v28 = vmul.f32 %v1870_v26, %v1870_v26 }
 0xa8e   : > { %v1871_v29 = vmul.f32 %v1869_v27, %v1869_v27 }
 0xa8f   : > { %v1876_v30 = vsel %vm746_vm1, %v1872_v28, 0.0 }
 0xa90   : > { %1877 = vadd.xlane.f32.xlu0 %v1876_v30  ;;  %v1873_v31 = vsel %vm746_vm1, %v1871_v29, 0.0 }
 0xa91   : > { %1874 = vadd.xlane.f32.xlu1 %v1873_v31 }
 0xb1d   : > { %v1878_v32 = vpop.xlane.xlu0 %1877 }
 0xb1e   : > { %v1880_v33 = vmul.f32 0.03125, %v1878_v32  ;;  %v1875_v34 = vpop.xlane.xlu1 %1874 }
 0xb1f   : > { %v1879_v36 = vmul.f32 0.03125, %v1875_v34 }
 0xb20   : > { %v1882_v39 = vadd.f32 1e-05, %v1880_v33 }
 0xb21   : > { %v1881_v40 = vadd.f32 1e-05, %v1879_v36 }
 0xb22   : > { %2310 = vrsqrt.f32 %v1882_v39 }
 0xb23   : > { %2312 = vrsqrt.f32 %v1881_v40 }
 0xb2c   : > { %v2311_v41 = vpop.eup %2310 }
 0xb2d   : > { %v2313_v44 = vpop.eup %2312  ;;  %v1886_v45 = vmul.f32 %v2311_v41, %v1870_v26 }
 0xb2e   : > { %v1885_v46 = vmul.f32 %v2313_v44, %v1869_v27 }
 0xb2f   : > { %v1894_v47 = vmul.f32 %v2082_v43, %v1886_v45 }
 0xb30   : > { %v1893_v48 = vmul.f32 %v2082_v43, %v1885_v46 }
 0xb31   : > { %v1902_v49 = vadd.f32 %v2083_v42, %v1894_v47 }
 0xb32   : > { %v1901_v50 = vadd.f32 %v2083_v42, %v1893_v48 }
 0xb33   : > { %1904 = vst.msk [vmem:[%s2702_s22 + $0x8] sm:$0xff] %vm746_vm1, %v1902_v49 }
 0xb34   : > { %1903 = vst.msk [vmem:[%s2702_s22] sm:$0xff] %vm746_vm1, %v1901_v50 }
 0xb35 PF: > { %s2710_s4 = sld [smem:[#allocation2_spill]] }
 0xb3b   : > { %s26_s21 = sadd.s32 1, %s2710_s4  }
 0xb3c   : > { %p23_p5 = scmp.ge.s32.totalorder %s26_s21, 4  }
 0xb3e   :  { %25 = sbr.rel (!%p23_p5) target bundleno = 7 (0x7), region = 147 }

</bundles_post_ra>
